<compile_context>
chip_gen: v5e
topology: v5e:2x2
jax: 0.10.0
libtpu: 0.0.40
codegen_flags: <defaults>
</compile_context>

<pallas_src>
import functools

import jax
import jax.numpy as jnp
from jax.experimental import pallas as pl
from jax.experimental.pallas import tpu as pltpu

_LANE = 128


def _num_tensorcores():
    """Best-effort TensorCores-per-chip (2 on v7x, else 1)."""
    # TODO(synk): verify via a trace that the size-2 "parallel" axis really
    # shards across both v7x TensorCores; if not, switch to CORE_PARALLEL.
    try:
        info = pltpu.get_tpu_info()
        for attr in ("num_cores", "num_tensorcores", "tensorcores_per_chip",
                     "cores_per_chip", "core_count"):
            v = getattr(info, attr, None)
            if isinstance(v, int) and v >= 1:
                return v
    except Exception:
        pass
    return 1


def _hdr_loss_kernel(d_ref, t_ref, out_ref, acc_ref, *, eps, n_valid,
                     steps_per_slice, may_need_mask):
    s = pl.program_id(1)

    # Zero the per-slice accumulator at the start of each slice.
    @pl.when(s == 0)
    def _():
        acc_ref[...] = jnp.zeros_like(acc_ref)

    d = d_ref[...].astype(jnp.float32)
    t = t_ref[...].astype(jnp.float32)

    diff = d - t
    denom = (d + jnp.float32(eps)) ** 2
    # Exact reciprocal (approx=True would exceed the test tolerance).
    vals = (diff * diff) * pl.reciprocal(denom, approx=False)

    block_rows, block_lanes = vals.shape
    block_elems = block_rows * block_lanes

    def _accumulate(v):
        if block_rows % 8 == 0:
            # vreg-aligned partial sums: pure vadds, no per-step XLU collapse.
            acc_ref[...] += v.reshape(block_rows // 8, 8, block_lanes).sum(axis=0)
        else:
            # Tiny full-extent block (rows not a multiple of 8): single row.
            acc_ref[0:1, :] += jnp.sum(v, axis=0, keepdims=True)

    if may_need_mask:
        # Unclamped global block index: overhang steps (index-clamped by the
        # in_map) get base >= n_valid, so they contribute exactly zero.
        global_block = pl.program_id(0) * steps_per_slice + s
        needs_mask = (global_block + 1) * block_elems > n_valid

        @pl.when(needs_mask)
        def _():
            base = global_block * block_elems          # int32-safe (asserted)
            row_ids = jax.lax.broadcasted_iota(jnp.int32, vals.shape, 0)
            lane_ids = jax.lax.broadcasted_iota(jnp.int32, vals.shape, 1)
            global_idx = base + row_ids * block_lanes + lane_ids
            # jnp.where (select) discards any NaN/Inf garbage from OOB rows;
            # do NOT refactor to multiply-by-mask (Inf * 0 = NaN).
            _accumulate(jnp.where(global_idx < n_valid, vals, jnp.float32(0.0)))

        @pl.when(jnp.logical_not(needs_mask))
        def _():
            _accumulate(vals)
    else:
        _accumulate(vals)

    # Single cross-sublane + cross-lane reduce per slice, in the epilogue.
    @pl.when(s == steps_per_slice - 1)
    def _():
        out_ref[0, 0] = jnp.sum(acc_ref[...])


def hdr_loss(denoised, target, eps=0.01, *, tile_rows=2048, num_slices=None):
    """Pallas implementation of HDRLoss.forward (value only)."""
    assert denoised.shape == target.shape, "shape mismatch"
    n = denoised.size
    assert n > 0, "empty input"
    # Kernel index math is int32; keep a healthy margin.
    assert n < 2 ** 30, "HDRLoss Pallas kernel: input too large for int32 indexing"

    flat_d = denoised.reshape(-1)
    flat_t = target.reshape(-1)

    rem = n % _LANE
    n_aligned = n - rem
    rows = n_aligned // _LANE

    # < 128-element tail handled with plain jnp (no whole-array pad copy).
    if rem:
        td = flat_d[n_aligned:].astype(jnp.float32)
        tt = flat_t[n_aligned:].astype(jnp.float32)
        tail_sum = jnp.sum((td - tt) ** 2 / (td + jnp.float32(eps)) ** 2)
    else:
        tail_sum = jnp.float32(0.0)

    if rows == 0:
        return tail_sum / jnp.float32(n)

    d2 = flat_d[:n_aligned].reshape(rows, _LANE)
    t2 = flat_t[:n_aligned].reshape(rows, _LANE)

    # Tile sizing: big tiles amortize per-step overhead; keep the (8, 128)
    # divisibility rule when not full-extent.  (2048, 128) f32 is already at
    # the HBM-roofline plateau — do not grow further.
    tile = min(tile_rows, rows)
    if tile < rows:
        tile = max(8, (tile // 8) * 8)

    num_blocks = pl.cdiv(rows, tile)
    if num_slices is None:
        num_slices = _num_tensorcores()
    slices = max(1, min(num_slices, num_blocks))
    steps_per_slice = pl.cdiv(num_blocks, slices)
    last_block = num_blocks - 1

    ragged = (rows % tile) != 0
    overhang = slices * steps_per_slice != num_blocks
    may_need_mask = ragged or overhang

    if overhang:
        def in_map(p, s):
            # Clamp overhanging steps of the last slice to a valid block; the
            # kernel masks their contribution to exactly zero.
            return (jnp.minimum(p * steps_per_slice + s, last_block), 0)
    else:
        def in_map(p, s):
            return (p * steps_per_slice + s, 0)

    kernel = functools.partial(
        _hdr_loss_kernel,
        eps=float(eps),
        n_valid=n_aligned,
        steps_per_slice=steps_per_slice,
        may_need_mask=may_need_mask,
    )

    itemsize = jnp.dtype(denoised.dtype).itemsize
    partials = pl.pallas_call(
        kernel,
        out_shape=jax.ShapeDtypeStruct((slices, 1), jnp.float32),
        grid_spec=pltpu.PrefetchScalarGridSpec(
            num_scalar_prefetch=0,
            grid=(slices, steps_per_slice),
            in_specs=[
                pl.BlockSpec((tile, _LANE), in_map),
                pl.BlockSpec((tile, _LANE), in_map),
            ],
            out_specs=pl.BlockSpec(
                (1, 1), lambda p, s: (p, 0), memory_space=pltpu.SMEM
            ),
            scratch_shapes=[pltpu.VMEM((8, _LANE), jnp.float32)],
        ),
        compiler_params=pltpu.CompilerParams(
            dimension_semantics=("parallel", "arbitrary"),
        ),
        cost_estimate=pl.CostEstimate(
            flops=8 * n,
            transcendentals=n,
            bytes_accessed=2 * n * itemsize,
        ),
    )(d2, t2)

    return (jnp.sum(partials) + tail_sum) / jnp.float32(n)


def _hdr_loss_ref(denoised, target, eps=0.01):
    """Pure-JAX reference mirroring the PyTorch forward."""
    d = denoised.astype(jnp.float32)
    t = target.astype(jnp.float32)
    loss = (d - t) ** 2 / (d + eps) ** 2
    return jnp.mean(loss.reshape(-1))


if __name__ == "__main__":
    key = jax.random.PRNGKey(0)

    shapes = [
        (2, 4, 16, 16),    # primary NCHW case (matches the PyTorch module)
        (3, 5, 24, 20),    # n % 128 != 0 -> jnp tail path, no pad copy
        (4, 4, 200, 200),  # multi-block, ragged last tile, masked epilogue
        (1, 1, 5, 7),      # n < 128 -> pure-jnp fallback path
    ]
    for shp in shapes:
        kd, kt, key = jax.random.split(key, 3)
        # Keep values positive-ish so (denoised + eps) stays away from 0,
        # as an HDR render buffer would.
        denoised = jax.random.uniform(kd, shp, dtype=jnp.float32) + 0.1
        target = denoised + 0.05 * jax.random.normal(kt, shp, dtype=jnp.float32)

        out = jax.block_until_ready(hdr_loss(denoised, target, eps=0.01))
        ref = _hdr_loss_ref(denoised, target, eps=0.01)
        assert jnp.allclose(out, ref, rtol=5e-5, atol=1e-6), (shp, out, ref)

    print("KERNEL_OK")
</pallas_src>

<mosaic_0001>
module attributes {stable_mosaic.version = 11 : i64} {
  func.func @_hdr_loss_kernel(%arg0: i32, %arg1: i32, %arg2: memref<16x128xf32, #tpu.memory_space<vmem>>, %arg3: memref<16x128xf32, #tpu.memory_space<vmem>>, %arg4: memref<1x1xf32, #tpu.memory_space<smem>>, %arg5: memref<8x128xf32, #tpu.memory_space<vmem>>) attributes {dimension_semantics = [#tpu.dimension_semantics<parallel>, #tpu.dimension_semantics<arbitrary>], iteration_bounds = array<i64: 1, 1>, scalar_prefetch = 0 : i64, scratch_operands = 1 : i64, tpu.core_type = #tpu.core_type<tc>, window_params = [{transform_indices = @transform_0, window_bounds = array<i64: 16, 128>}, {transform_indices = @transform_1, window_bounds = array<i64: 16, 128>}, {transform_indices = @transform_2, window_bounds = array<i64: 1, 1>}]} {
    %c0_i32 = arith.constant 0 : i32
    %0 = arith.cmpi eq, %arg1, %c0_i32 : i32
    %1 = arith.extui %0 : i1 to i32
    %c0_i32_0 = arith.constant 0 : i32
    %2 = arith.cmpi ne, %1, %c0_i32_0 : i32
    scf.if %2 {
      %cst_11 = arith.constant 0.000000e+00 : f32
      %20 = vector.broadcast %cst_11 : f32 to vector<8x128xf32>
      %c0_12 = arith.constant 0 : index
      %c0_13 = arith.constant 0 : index
      %21 = vector.load %arg5[%c0_12, %c0_13] : memref<8x128xf32, #tpu.memory_space<vmem>>, vector<8x128xf32>
      tpu.vector_store %arg5[%c0_12, %c0_13], %20 {strides = array<i32>} : memref<8x128xf32, #tpu.memory_space<vmem>>, vector<8x128xf32>,
    } else {
    }
    %c0 = arith.constant 0 : index
    %c0_1 = arith.constant 0 : index
    %3 = vector.load %arg2[%c0, %c0_1] : memref<16x128xf32, #tpu.memory_space<vmem>>, vector<16x128xf32>
    %c0_2 = arith.constant 0 : index
    %c0_3 = arith.constant 0 : index
    %4 = vector.load %arg3[%c0_2, %c0_3] : memref<16x128xf32, #tpu.memory_space<vmem>>, vector<16x128xf32>
    %5 = arith.subf %3, %4 : vector<16x128xf32>
    %cst = arith.constant 0.00999999977 : f32
    %6 = vector.broadcast %cst : f32 to vector<16x128xf32>
    %7 = arith.addf %3, %6 : vector<16x128xf32>
    %8 = arith.mulf %7, %7 : vector<16x128xf32>
    %9 = arith.mulf %5, %5 : vector<16x128xf32>
    %10 = tpu.reciprocal %8 : vector<16x128xf32> -> vector<16x128xf32>
    %11 = arith.mulf %9, %10 : vector<16x128xf32>
    %c0_4 = arith.constant 0 : index
    %c0_5 = arith.constant 0 : index
    %12 = vector.load %arg5[%c0_4, %c0_5] : memref<8x128xf32, #tpu.memory_space<vmem>>, vector<8x128xf32>
    %13 = vector.shape_cast %11 : vector<16x128xf32> to vector<2x8x128xf32>
    %cst_6 = arith.constant dense<0.000000e+00> : vector<8x128xf32>
    %14 = vector.multi_reduction <add>, %13, %cst_6 [0] : vector<2x8x128xf32> to vector<8x128xf32>
    %15 = arith.addf %12, %14 : vector<8x128xf32>
    %c0_7 = arith.constant 0 : index
    %c0_8 = arith.constant 0 : index
    %16 = vector.load %arg5[%c0_7, %c0_8] : memref<8x128xf32, #tpu.memory_space<vmem>>, vector<8x128xf32>
    tpu.vector_store %arg5[%c0_7, %c0_8], %15 {strides = array<i32>} : memref<8x128xf32, #tpu.memory_space<vmem>>, vector<8x128xf32>,
    %c0_i32_9 = arith.constant 0 : i32
    %17 = arith.cmpi eq, %arg1, %c0_i32_9 : i32
    %18 = arith.extui %17 : i1 to i32
    %c0_i32_10 = arith.constant 0 : i32
    %19 = arith.cmpi ne, %18, %c0_i32_10 : i32
    scf.if %19 {
      %c0_11 = arith.constant 0 : index
      %c0_12 = arith.constant 0 : index
      %20 = vector.load %arg5[%c0_11, %c0_12] : memref<8x128xf32, #tpu.memory_space<vmem>>, vector<8x128xf32>
      %21 = vector.shape_cast %20 : vector<8x128xf32> to vector<1x8x128xf32>
      %cst_13 = arith.constant dense<0.000000e+00> : vector<1xf32>
      %22 = vector.multi_reduction <add>, %21, %cst_13 [1, 2] : vector<1x8x128xf32> to vector<1xf32>
      %23 = vector.shape_cast %22 : vector<1xf32> to vector<1x1x1xf32>
      %24 = vector.extract %23[0, 0, 0] : f32 from vector<1x1x1xf32>
      %c0_14 = arith.constant 0 : index
      %c0_15 = arith.constant 0 : index
      %25 = memref.load %arg4[%c0_14, %c0_15] : memref<1x1xf32, #tpu.memory_space<smem>>
      memref.store %24, %arg4[%c0_14, %c0_15] : memref<1x1xf32, #tpu.memory_space<smem>>
    } else {
    }
    return
  }
  func.func @transform_0(%arg0: i32, %arg1: i32) -> (i32, i32) {
    %c1_i32 = arith.constant 1 : i32
    %0 = arith.muli %arg0, %c1_i32 : i32
    %1 = arith.addi %0, %arg1 : i32
    %c0_i32 = arith.constant 0 : i32
    %c0_i32_0 = arith.constant 0 : i32
    return %1, %c0_i32 : i32, i32
  }
  func.func @transform_1(%arg0: i32, %arg1: i32) -> (i32, i32) {
    %c1_i32 = arith.constant 1 : i32
    %0 = arith.muli %arg0, %c1_i32 : i32
    %1 = arith.addi %0, %arg1 : i32
    %c0_i32 = arith.constant 0 : i32
    %c0_i32_0 = arith.constant 0 : i32
    return %1, %c0_i32 : i32, i32
  }
  func.func @transform_2(%arg0: i32, %arg1: i32) -> (i32, i32) {
    %c0_i32 = arith.constant 0 : i32
    %c0_i32_0 = arith.constant 0 : i32
    return %arg0, %c0_i32 : i32, i32
  }
}

</mosaic_0001>

<bundles_post_ra>
// kernel: tpu_custom_call.1
= control target key start
LH: loop header
LB: loop body
LE: loop exit
PB: predicated region body
PF: predicated region fallthrough
CT: control target
= control target key end

     0   :  { %7 = vsyncpa [#allocation4], 0  ;;  %s245_s0 = inlined_call_operand.hbm [shape: f32[16,128], index: 0, kind: input, shape index: {}]   ;;  %s246_s1 = inlined_call_operand.hbm [shape: f32[16,128], index: 1, kind: input, shape index: {}]   ;;  %s247_s2 = inlined_call_operand.hbm [shape: f32[1,1], index: 2, kind: output, shape index: {}]  }
   0x1   :  { %8 = vsyncpa [#allocation7], 0 }
   0x2   :  { %9 = vsyncpa [#allocation5], 0  ;;  %s18_s11 = sshll.u32 %s245_s0, 4  ;;  %s216_s12 = smov [#allocation3]   ;;  %s19_s11 = int_to_ptr.hbm [resolvable:$true] %s18_s11 }
   0x3   :  { %s20_s13 = sshll.u32 %s216_s12, 4  ;;  %s35_s16 = sshll.u32 %s246_s1, 4  ;;  %s21_s13 = int_to_ptr.vmem [resolvable:$true] %s20_s13  ;;  %s36_s16 = int_to_ptr.hbm [resolvable:$true] %s35_s16 }
   0x4   :  { %s217_s17 = smov 128   ;;  %s218_s18 = smov 8  }
   0x5   :  { %26 = dma.hbm_to_vmem [thread:$0]  %s19_s11, 256, %s21_s13, [#allocation4], %s217_s17, %s217_s17, %s218_s18  }
   0x6   :  { %s219_s19 = smov [#allocation6]  }
   0x7   :  { %s37_s20 = sshll.u32 %s219_s19, 4  ;;  %s38_s20 = int_to_ptr.vmem [resolvable:$true] %s37_s20 }
   0x8   :  { %43 = dma.hbm_to_vmem [thread:$0]  %s36_s16, 256, %s38_s20, [#allocation7], %s217_s17, %s217_s17, %s218_s18  }
   0x9   :  { %210 = dma.done.wait [#allocation4], 256  }
   0xa   :  { %211 = vsyncadd [#allocation4], 4294967040 }
   0xb   :  { %212 = dma.done.wait [#allocation7], 256  }
   0xc   :  { %213 = vsyncadd [#allocation7], 4294967040  ;;  %v61_v0 = vld [vmem:[#allocation3] sm:$0xff]  ;;  %v62_v1 = vld [vmem:[#allocation3 + $0x8] sm:$0xff]  ;;  %s127_s21 = sshll.u32 %s247_s2, 4  ;;  %s220_s23 = smov [#allocation8]   ;;  %s128_s21 = int_to_ptr.hbm [resolvable:$true] %s127_s21 }
   0xd   :  { %v67_v2 = vadd.f32 0.01, %v61_v0  ;;  %v68_v3 = vadd.f32 0.01, %v62_v1  ;;  %v63_v6 = vld [vmem:[#allocation6] sm:$0xff]  ;;  %v64_v7 = vld [vmem:[#allocation6 + $0x8] sm:$0xff] }
   0xe   :  { %v65_v10 = vsub.f32 %v61_v0, %v63_v6  ;;  %v66_v12 = vsub.f32 %v62_v1, %v64_v7 }
   0xf   :  { %v69_v4 = vmul.f32 %v67_v2, %v67_v2  ;;  %v70_v5 = vmul.f32 %v68_v3, %v68_v3 }
  0x10   :  { %v71_v23 = vmul.f32 %v65_v10, %v65_v10  ;;  %v72_v26 = vmul.f32 %v66_v12, %v66_v12 }
  0x11   :  { %146 = vrcp.f32 %v69_v4  ;;  %vm78_vm0 = vweird.f32 %v69_v4  ;;  %v84_v13 = vand.u32 2147483648, %v69_v4  ;;  %v82_v16 = vand.u32 2147483647, %v69_v4 }
  0x12   :  { %148 = vrcp.f32 %v70_v5  ;;  %v98_v17 = vand.u32 2147483648, %v70_v5  ;;  %vm92_vm2 = vweird.f32 %v70_v5  ;;  %v96_v19 = vand.u32 2147483647, %v70_v5 }
  0x13   :  { %v85_v21 = vor.u32 1.1754944e-38, %v84_v13  ;;  %vm83_vm5 = vcmp.eq.f32.partialorder %v82_v16, 8.507059e+37 }
  0x14   :  { %v99_v25 = vor.u32 1.1754944e-38, %v98_v17  ;;  %vm97_vm7 = vcmp.eq.f32.partialorder %v96_v19, 8.507059e+37 }
  0x17   :  { %v147_v8 = vpop.eup %146 }
  0x18   :  { %v149_v9 = vpop.eup %148  ;;  %v74_v11 = vmul.f32 %v147_v8, %v69_v4  ;;  %vm79_vm1 = vweird.f32 %v147_v8 }
  0x19   :  { %v88_v14 = vmul.f32 %v149_v9, %v70_v5  ;;  %vm93_vm3 = vweird.f32 %v149_v9  ;;  %vm80_vm4 = vmor %vm78_vm0, %vm79_vm1 }
  0x1a   :  { %v75_v15 = vsub.f32 1.0, %v74_v11  ;;  %vm94_vm6 = vmor %vm92_vm2, %vm93_vm3 }
  0x1b   :  { %v89_v18 = vsub.f32 1.0, %v88_v14 }
  0x1c   :  { %v76_v20 = vmul.f32 %v147_v8, %v75_v15 }
  0x1d   :  { %v90_v22 = vmul.f32 %v149_v9, %v89_v18 }
  0x1e   :  { %v77_v24 = vadd.f32 %v147_v8, %v76_v20 }
  0x1f   :  { %v91_v27 = vadd.f32 %v149_v9, %v90_v22 }
  0x20   :  { %v81_v28 = vsel %vm80_vm4, %v147_v8, %v77_v24 }
  0x21   :  { %v86_v29 = vsel %vm83_vm5, %v85_v21, %v81_v28  ;;  %v95_v30 = vsel %vm94_vm6, %v149_v9, %v91_v27 }
  0x22   :  { %v100_v31 = vsel %vm97_vm7, %v99_v25, %v95_v30  ;;  %v101_v32 = vmul.f32 %v86_v29, %v71_v23 }
  0x23   :  { %v102_v33 = vmul.f32 %v100_v31, %v72_v26 }
  0x25   :  { %v104_v34 = vadd.f32 %v102_v33, %v101_v32 }
  0x27   :  { %111 = vadd.xlane.f32.xlu0 %v104_v34 }
  0x9a   :  { %v112_v35 = vpop.xlane.xlu0 %111 }
  0x9b   :  { %v113_v36 = vrot.slane %v112_v35, 4 }
  0x9d   :  { %v114_v37 = vadd.f32 %v113_v36, %v112_v35 }
  0x9f   :  { %v115_v38 = vrot.slane %v114_v37, 2 }
  0xa1   :  { %v116_v39 = vadd.f32 %v115_v38, %v114_v37 }
  0xa3   :  { %v117_v40 = vrot.slane %v116_v39, 1 }
  0xa5   :  { %v118_v41 = vadd.f32 %v117_v40, %v116_v39 }
  0xa7   :  { %139 = vpush %v118_v41 }
  0xd8   :  { %s140_s22 = spop %139 }
  0xd9   :  { %121 = sst [smem:[#allocation8]] %s140_s22 }
  0xda   :  { %130 = dma.smem_to_hbm %s220_s23, 16, %s128_s21, [#allocation5]  }
  0xdb   :  { %214 = dma.done.wait [#allocation5], 16  }
  0xdc   :  { %215 = vsyncadd [#allocation5], 4294967280 }
  0xdd   :  { %135 = sfence }
  0xde   :  { %136 = vsyncpa [#allocation4], 1 }
  0xdf   :  { %137 = vsyncpa [#allocation7], 1 }
  0xe0   :  { %138 = vsyncpa [#allocation5], 1 }

</bundles_post_ra>
